<compile_context>
chip_gen: v6e
topology: v6e:2x2x1
jax: 0.10.0
libtpu: 0.0.40
codegen_flags: <defaults>
</compile_context>

<pallas_src>
import jax
import jax.numpy as jnp
from jax.experimental import pallas as pl
from jax.experimental.pallas import tpu as pltpu


def _round_up(x, m):
    return (x + m - 1) // m * m


def _logreg_kernel(x_ref, w_ref, b_ref, o_ref):
    # x_ref: (TBp, Kp) lane-packed activations; w_ref: (Kp, Np) packed
    # block-diagonal weight (already transposed, so contraction is ((1,),(0,))
    # -> straight MXU push, no RHS relayout); b_ref: (1, Np) tiled bias.
    z = jnp.dot(x_ref[...], w_ref[...], preferred_element_type=jnp.float32)
    z = z + b_ref[...].astype(jnp.float32)                 # VPU bias broadcast
    o_ref[...] = jax.nn.sigmoid(z).astype(o_ref.dtype)     # EUP exp + VPU epilogue


def logistic_regression(x, weight, bias):
    """sigmoid(linear(x)).  x: [B, D_in]; weight: [D_out, D_in]; bias: [D_out]."""
    B, D_in = x.shape
    D_out, D_in_w = weight.shape
    assert D_in == D_in_w, "weight must be [D_out, D_in] (PyTorch nn.Linear layout)"

    dtype = x.dtype
    itemsize = jnp.dtype(dtype).itemsize
    sub = max(8, 32 // itemsize)            # dtype-aware sublane multiple

    # ---- lane-packing factor ----
    if D_out < 128 and 128 % D_out == 0:
        P = 128 // D_out
    else:
        P = 1                               # fallback: no packing
    Kp, Np = P * D_in, P * D_out

    # Pad batch only to the packing multiple (<= P-1 zero rows; cheap).
    B_pad = _round_up(B, P)
    if B_pad != B:
        x = jnp.pad(x, ((0, B_pad - B), (0, 0)))
    Bp = B_pad // P
    x_p = x.reshape(Bp, Kp)                 # free view of the same memory

    # One-time packed weight (block-diagonal) and tiled bias.
    w_p = jnp.kron(jnp.eye(P, dtype=weight.dtype), weight.T)   # (Kp, Np)
    b_p = jnp.tile(bias, P).reshape(1, Np)                     # (1, Np)

    # ---- VMEM-budgeted batch tile (in packed rows) ----
    try:
        vmem_cap = int(pltpu.get_tpu_info().vmem_capacity_bytes)
    except Exception:
        vmem_cap = 64 << 20                 # v7x worst case
    budget = int(vmem_cap * 0.75)           # ~25% headroom for compiler scratch

    # Padded-VMEM footprints (minor dim padded to 128 lanes, rows to sublanes).
    Kp_vm = _round_up(Kp, 128)
    Np_vm = _round_up(Np, 128)
    resident = (_round_up(Kp, sub) * Np_vm + sub * Np_vm) * 4        # W + bias (f32)
    per_row = 2 * (Kp_vm + Np_vm) * itemsize    # double-buffered x + out, per packed row
    headroom = 2 << 20

    tb_max = max(sub, (budget - resident - headroom) // per_row)
    TBp = min(tb_max, 4096)                 # ~32K original rows per tile
    TBp = max(sub, TBp // sub * sub)

    if TBp >= Bp:
        if Bp > 2 * sub:
            # keep >=2 grid steps so "parallel" can split across v7x's two TCs
            TBp = _round_up(pl.cdiv(Bp, 2), sub)
        else:
            TBp = Bp                        # tiny batch: single full block
    grid = (pl.cdiv(Bp, TBp),)
    # NOTE: the last grid step may overhang Bp; Pallas masks the out-of-bounds
    # output rows, so garbage flowing through sigmoid in dead rows is harmless.

    needed = resident + TBp * per_row + headroom
    vmem_limit = int(min(max(needed, 32 << 20), budget))

    cost = pl.CostEstimate(
        flops=2 * Bp * Kp * Np,
        transcendentals=B_pad * D_out,
        bytes_accessed=itemsize * (B_pad * D_in + B_pad * D_out)
        + 4 * (Kp * Np + Np),
    )

    out_p = pl.pallas_call(
        _logreg_kernel,
        out_shape=jax.ShapeDtypeStruct((Bp, Np), dtype),
        grid_spec=pltpu.PrefetchScalarGridSpec(
            num_scalar_prefetch=0,
            grid=grid,
            in_specs=[
                pl.BlockSpec((TBp, Kp), lambda i: (i, 0)),   # streamed x tiles
                pl.BlockSpec((Kp, Np), lambda i: (0, 0)),    # resident packed weight
                pl.BlockSpec((1, Np), lambda i: (0, 0)),     # resident packed bias
            ],
            out_specs=pl.BlockSpec((TBp, Np), lambda i: (i, 0)),
        ),
        compiler_params=pltpu.CompilerParams(
            dimension_semantics=("parallel",),   # megacore-shardable batch axis
            vmem_limit_bytes=vmem_limit,
        ),
        cost_estimate=cost,
    )(x_p, w_p, b_p)

    out = out_p.reshape(B_pad, D_out)       # free un-reshape: same memory layout
    return out[:B] if B_pad != B else out


if __name__ == "__main__":
    # Small shapes consistent with the module: batch=8, input_dim=32, output_dim=16
    B, D_IN, D_OUT = 8, 32, 16

    key = jax.random.PRNGKey(0)
    kx, kw, kb = jax.random.split(key, 3)

    x = jax.random.normal(kx, (B, D_IN), dtype=jnp.float32)
    bound = 1.0 / (D_IN ** 0.5)             # nn.Linear-style uniform init
    weight = jax.random.uniform(kw, (D_OUT, D_IN), minval=-bound, maxval=bound,
                                dtype=jnp.float32)
    bias = jax.random.uniform(kb, (D_OUT,), minval=-bound, maxval=bound,
                              dtype=jnp.float32)

    out = logistic_regression(x, weight, bias)
    jax.block_until_ready(out)

    # Reference check in plain JAX
    ref = jax.nn.sigmoid(x @ weight.T + bias)
    assert out.shape == (B, D_OUT)
    assert jnp.allclose(out, ref, atol=1e-5, rtol=1e-5)

    print("KERNEL_OK")
</pallas_src>

<mosaic_0001>
module attributes {stable_mosaic.version = 11 : i64} {
  func.func @_logreg_kernel(%arg0: i32, %arg1: memref<1x256xf32, #tpu.memory_space<vmem>>, %arg2: memref<256x128xf32, #tpu.memory_space<vmem>>, %arg3: memref<1x128xf32, #tpu.memory_space<vmem>>, %arg4: memref<1x128xf32, #tpu.memory_space<vmem>>) attributes {dimension_semantics = [#tpu.dimension_semantics<parallel>], iteration_bounds = array<i64: 1>, scalar_prefetch = 0 : i64, scratch_operands = 0 : i64, tpu.core_type = #tpu.core_type<tc>, window_params = [{transform_indices = @transform_0, window_bounds = array<i64: 1, 256>}, {pipeline_mode = #tpu.pipeline_mode<synchronous>, transform_indices = @transform_1, window_bounds = array<i64: 256, 128>}, {pipeline_mode = #tpu.pipeline_mode<synchronous>, transform_indices = @transform_2, window_bounds = array<i64: 1, 128>}, {transform_indices = @transform_3, window_bounds = array<i64: 1, 128>}]} {
    %c0 = arith.constant 0 : index
    %c0_0 = arith.constant 0 : index
    %0 = vector.load %arg1[%c0, %c0_0] : memref<1x256xf32, #tpu.memory_space<vmem>>, vector<1x256xf32>
    %c0_1 = arith.constant 0 : index
    %c0_2 = arith.constant 0 : index
    %1 = vector.load %arg2[%c0_1, %c0_2] : memref<256x128xf32, #tpu.memory_space<vmem>>, vector<256x128xf32>
    %cst = arith.constant dense<0.000000e+00> : vector<1x128xf32>
    %2 = tpu.matmul %0, %1, %cst {dimension_numbers = #tpu.dot_dimension_numbers<[1], [0], [0], [1], [0, 0, 1, 1], [], []>} : vector<1x256xf32>, vector<256x128xf32>, vector<1x128xf32> -> vector<1x128xf32>
    %c0_3 = arith.constant 0 : index
    %c0_4 = arith.constant 0 : index
    %3 = vector.load %arg3[%c0_3, %c0_4] : memref<1x128xf32, #tpu.memory_space<vmem>>, vector<1x128xf32>
    %4 = arith.addf %2, %3 : vector<1x128xf32>
    %5 = arith.negf %4 : vector<1x128xf32>
    %6 = math.exp %5 : vector<1x128xf32>
    %cst_5 = arith.constant 1.000000e+00 : f32
    %7 = vector.broadcast %cst_5 : f32 to vector<1x128xf32>
    %8 = arith.addf %7, %6 : vector<1x128xf32>
    %9 = arith.divf %7, %8 : vector<1x128xf32>
    %c0_6 = arith.constant 0 : index
    %c0_7 = arith.constant 0 : index
    %10 = vector.load %arg4[%c0_6, %c0_7] : memref<1x128xf32, #tpu.memory_space<vmem>>, vector<1x128xf32>
    tpu.vector_store %arg4[%c0_6, %c0_7], %9 {strides = array<i32>} : memref<1x128xf32, #tpu.memory_space<vmem>>, vector<1x128xf32>,
    return
  }
  func.func @transform_0(%arg0: i32) -> (i32, i32) {
    %c0_i32 = arith.constant 0 : i32
    %c0_i32_0 = arith.constant 0 : i32
    return %arg0, %c0_i32 : i32, i32
  }
  func.func @transform_1(%arg0: i32) -> (i32, i32) {
    %c0_i32 = arith.constant 0 : i32
    %c0_i32_0 = arith.constant 0 : i32
    %c0_i32_1 = arith.constant 0 : i32
    return %c0_i32, %c0_i32_0 : i32, i32
  }
  func.func @transform_2(%arg0: i32) -> (i32, i32) {
    %c0_i32 = arith.constant 0 : i32
    %c0_i32_0 = arith.constant 0 : i32
    %c0_i32_1 = arith.constant 0 : i32
    return %c0_i32, %c0_i32_0 : i32, i32
  }
  func.func @transform_3(%arg0: i32) -> (i32, i32) {
    %c0_i32 = arith.constant 0 : i32
    %c0_i32_0 = arith.constant 0 : i32
    return %arg0, %c0_i32 : i32, i32
  }
}

</mosaic_0001>

<bundles_post_ra>
// kernel: tpu_custom_call.1
= control target key start
LH: loop header
LB: loop body
LE: loop exit
PB: predicated region body
PF: predicated region fallthrough
CT: control target
= control target key end

     0   :  { %8 = vsyncpa [#allocation3], 0  ;;  %s327_s0 = inlined_call_operand.hbm [shape: f32[1,256], index: 0, kind: input, shape index: {}]   ;;  %s328_s1 = inlined_call_operand.hbm [shape: f32[256,128], index: 1, kind: input, shape index: {}]   ;;  %s329_s2 = inlined_call_operand.vmem [shape: f32[1,128], index: 2, kind: input, shape index: {}]   ;;  %s330_s3 = inlined_call_operand.hbm [shape: f32[1,128], index: 3, kind: output, shape index: {}]  }
   0x1   :  { %9 = vsyncpa [#allocation6], 0 }
   0x2   :  { %10 = vsyncpa [#allocation4], 0  ;;  %s290_s12 = smov [#allocation2]   ;;  %s291_s14 = smov [#allocation5]  }
   0x3   :  { %s17_s13 = sshll.u32 %s290_s12, 4  ;;  %s26_s15 = sshll.u32 %s291_s14, 4  ;;  %s18_s13 = int_to_ptr.vmem [resolvable:$true] %s17_s13  ;;  %s27_s15 = int_to_ptr.vmem [resolvable:$true] %s26_s15 }
   0x4   :  { %s232_s16 = scalar_lea.vmem %s18_s13, 32  ;;  %p237_p1 = scmp.lt.s32.totalorder %s18_s13, %s18_s13 }
   0x5   :  { %p233_p0 = scmp.ne.s32.totalorder %s18_s13, %s232_s16  ;;  %p238_p2 = scmp.lt.s32.totalorder %s232_s16, %s232_s16 }
   0x7   :  { %p239_p3 = por %p238_p2, %p237_p1 }
   0x9   :  { %p240_p4 = pnand %p239_p3, %p233_p0 }
   0xb   :  { %243 = shalt.err (!%p240_p4)
}
   0xc   :  { %20 = dma.hbm_to_vmem [thread:$0]  %s327_s0, 32, %s18_s13, [#allocation3]  }
   0xd   :  { %s252_s19 = scalar_lea.vmem %s27_s15, 4096  ;;  %p257_p6 = scmp.lt.s32.totalorder %s27_s15, %s27_s15 }
   0xe   :  { %p253_p5 = scmp.ne.s32.totalorder %s27_s15, %s252_s19  ;;  %p258_p7 = scmp.lt.s32.totalorder %s252_s19, %s252_s19 }
  0x10   :  { %p259_p8 = por %p258_p7, %p257_p6 }
  0x12   :  { %p260_p9 = pnand %p259_p8, %p253_p5 }
  0x14   :  { %263 = shalt.err (!%p260_p9)
}
  0x15   :  { %s292_s20 = smov 128   ;;  %s293_s21 = smov 8  }
  0x16   :  { %32 = dma.hbm_to_vmem [thread:$0]  %s328_s1, 4096, %s27_s15, [#allocation6], %s292_s20, %s292_s20, %s293_s21  }
  0x17   :  { %284 = dma.done.wait [#allocation3], 32  }
  0x18   :  { %285 = vsyncadd [#allocation3], 4294967264 }
  0x19   :  { %286 = dma.done.wait [#allocation6], 4096  }
  0x1a   :  { %287 = vsyncadd [#allocation6], 4294963200  ;;  %v76_v0 = vlaneseq  ;;  %v73_v1 = vld [vmem:[#allocation5 + $0xf8] sm:$0xff]  ;;  %v72_v3 = vld [vmem:[#allocation5 + $0xf0] sm:$0xff]  ;;  %s294_s24 = smov [#allocation7]  }
  0x1b   :  { %v57_v2 = vld [vmem:[#allocation5 + $0x78] sm:$0xff]  ;;  %180 = vmatprep.subr.mxu0 %v73_v1  ;;  %v56_v4 = vld [vmem:[#allocation5 + $0x70] sm:$0xff]  ;;  %v71_v5 = vld [vmem:[#allocation5 + $0xe8] sm:$0xff]  ;;  %s169_s25 = sshll.u32 %s294_s24, 4  ;;  %s170_s25 = int_to_ptr.vmem [resolvable:$true] %s169_s25 }
  0x1c   :  { %181 = vmatpush3.msra.mxu0 %v57_v2  ;;  %v55_v6 = vld [vmem:[#allocation5 + $0x68] sm:$0xff]  ;;  %v77_v7 = vshrl.u32 %v76_v0, 7  ;;  %v70_v8 = vld [vmem:[#allocation5 + $0xe0] sm:$0xff]  ;;  %v69_v10 = vld [vmem:[#allocation5 + $0xd8] sm:$0xff]  ;;  %s264_s26 = scalar_lea.vmem %s170_s25, 16  ;;  %s268_s27 = scalar_lea.vmem %s170_s25, 32 }
  0x1d   :  { %182 = vmatprep.subr.mxu0 %v72_v3  ;;  %v54_v9 = vld [vmem:[#allocation5 + $0x60] sm:$0xff]  ;;  %v53_v11 = vld [vmem:[#allocation5 + $0x58] sm:$0xff]  ;;  %v68_v13 = vld [vmem:[#allocation5 + $0xd0] sm:$0xff]  ;;  %p265_p10 = scmp.ne.s32.totalorder %s170_s25, %s264_s26  ;;  %p269_p11 = scmp.lt.s32.totalorder %s170_s25, %s170_s25 }
  0x1e   :  { %183 = vmatpush3.msra.mxu0 %v56_v4  ;;  %v82_v12 = vsub.s32 1, %v77_v7  ;;  %v52_v14 = vld [vmem:[#allocation5 + $0x50] sm:$0xff]  ;;  %v67_v15 = vld [vmem:[#allocation5 + $0xc8] sm:$0xff]  ;;  %v41_v16 = vld [vmem:[#allocation2] sm:$0x3]  ;;  %v78_v33 = vsub.s32 0, %v77_v7  ;;  %p270_p12 = scmp.lt.s32.totalorder %s268_s27, %s264_s26 }
  0x1f   :  { %184 = vmatprep.subr.mxu0 %v71_v5  ;;  %v51_v17 = vld [vmem:[#allocation5 + $0x48] sm:$0xff]  ;;  %v66_v19 = vld [vmem:[#allocation5 + $0xc0] sm:$0xff]  ;;  %v65_v21 = vld [vmem:[#allocation5 + $0xb8] sm:$0xff] }
  0x20   :  { %185 = vmatpush3.msra.mxu0 %v55_v6  ;;  %v83_v18 = vrot.slane %v41_v16, %v82_v12  ;;  %v50_v20 = vld [vmem:[#allocation5 + $0x40] sm:$0xff]  ;;  %v49_v22 = vld [vmem:[#allocation5 + $0x38] sm:$0xff]  ;;  %v64_v23 = vld [vmem:[#allocation5 + $0xb0] sm:$0xff]  ;;  %v79_v38 = vrot.slane %v41_v16, %v78_v33  ;;  %p271_p13 = por %p270_p12, %p269_p11 }
  0x21   :  { %186 = vmatprep.subr.mxu0 %v70_v8  ;;  %v48_v24 = vld [vmem:[#allocation5 + $0x30] sm:$0xff]  ;;  %v63_v25 = vld [vmem:[#allocation5 + $0xa8] sm:$0xff]  ;;  %v62_v27 = vld [vmem:[#allocation5 + $0xa0] sm:$0xff] }
  0x22   :  { %187 = vmatpush3.msra.mxu0 %v54_v9  ;;  %150 = vmatprep.mubr.f32.mxu0 %v83_v18  ;;  %v47_v26 = vld [vmem:[#allocation5 + $0x28] sm:$0xff]  ;;  %v46_v28 = vld [vmem:[#allocation5 + $0x20] sm:$0xff]  ;;  %v61_v29 = vld [vmem:[#allocation5 + $0x98] sm:$0xff]  ;;  %p272_p0 = pnand %p271_p13, %p265_p10 }
  0x23   :  { %188 = vmatprep.subr.mxu0 %v69_v10  ;;  %v45_v30 = vld [vmem:[#allocation5 + $0x18] sm:$0xff]  ;;  %v60_v31 = vld [vmem:[#allocation5 + $0x90] sm:$0xff]  ;;  %v59_v34 = vld [vmem:[#allocation5 + $0x88] sm:$0xff] }
  0x24   :  { %189 = vmatpush3.msra.mxu0 %v53_v11  ;;  %v44_v32 = vld [vmem:[#allocation5 + $0x10] sm:$0xff]  ;;  %v43_v35 = vld [vmem:[#allocation5 + $0x8] sm:$0xff]  ;;  %v58_v36 = vld [vmem:[#allocation5 + $0x80] sm:$0xff] }
  0x25   :  { %190 = vmatprep.subr.mxu0 %v68_v13  ;;  %v42_v37 = vld [vmem:[#allocation5] sm:$0xff]  ;;  %v74_v40 = vld [vmem:[%s329_s2] sm:$0x1] }
  0x26   :  { %191 = vmatpush3.msra.mxu0 %v52_v14 }
  0x27   :  { %192 = vmatprep.subr.mxu0 %v67_v15 }
  0x28   :  { %193 = vmatpush3.msra.mxu0 %v51_v17 }
  0x29   :  { %194 = vmatprep.subr.mxu0 %v66_v19 }
  0x2a   :  { %195 = vmatpush3.msra.mxu0 %v50_v20 }
  0x2b   :  { %196 = vmatprep.subr.mxu0 %v65_v21 }
  0x2c   :  { %197 = vmatpush3.msra.mxu0 %v49_v22 }
  0x2d   :  { %198 = vmatprep.subr.mxu0 %v64_v23 }
  0x2e   :  { %199 = vmatpush3.msra.mxu0 %v48_v24 }
  0x2f   :  { %200 = vmatprep.subr.mxu0 %v63_v25 }
  0x30   :  { %201 = vmatpush3.msra.mxu0 %v47_v26 }
  0x31   :  { %202 = vmatprep.subr.mxu0 %v62_v27 }
  0x32   :  { %203 = vmatpush3.msra.mxu0 %v46_v28 }
  0x33   :  { %204 = vmatprep.subr.mxu0 %v61_v29 }
  0x34   :  { %205 = vmatpush3.msra.mxu0 %v45_v30 }
  0x35   :  { %206 = vmatprep.subr.mxu0 %v60_v31 }
  0x36   :  { %207 = vmatpush3.msra.mxu0 %v44_v32 }
  0x37   :  { %208 = vmatprep.subr.mxu0 %v59_v34 }
  0x38   :  { %209 = vmatpush3.msra.mxu0 %v43_v35 }
  0x39   :  { %210 = vmatprep.subr.mxu0 %v58_v36 }
  0x3a   :  { %211 = vmatpush3.msra.mxu0 %v42_v37 }
  0x3b   :  { %151 = vmatmul.mubr.f32.vlgmr.msra.gmra.mxu0 %v79_v38 }
  0xfb   :  { %v212_v39 = vpop.f32.mrf.mxu0 }
  0xfd   :  { %v213_v41 = vpop.f32.mrf.mxu0 }
  0xfe   :  { %v214_v42 = vadd.f32 %v213_v41, %v212_v39 }
 0x100   :  { %v153_v43 = vadd.f32 %v214_v42, %v74_v40 }
 0x102   :  { %v179_v44 = vmul.f32 -1.442695, %v153_v43 }
 0x104   :  { %220 = vpow2.f32 %v179_v44 }
 0x111   :  { %v221_v45 = vpop.eup %220 }
 0x112   :  { %v159_v46 = vadd.f32 1.0, %v221_v45 }
 0x114   :  { %222 = vrcp.f32 %v159_v46 }
 0x121   :  { %v223_v47 = vpop.eup %222 }
 0x122   :  { %162 = vst [vmem:[#allocation7] sm:$0x1] %v223_v47 }
 0x123   :  { %275 = shalt.err (!%p272_p0)
}
 0x124   :  { %172 = dma.vmem_to_hbm [thread:$0]  %s170_s25, 16, %s330_s3, [#allocation4]  }
 0x125   :  { %288 = dma.done.wait [#allocation4], 16  }
 0x126   :  { %289 = vsyncadd [#allocation4], 4294967280 }
 0x127   :  { %176 = vsyncpa [#allocation3], 1 }
 0x128   :  { %177 = vsyncpa [#allocation6], 1 }
 0x129   :  { %178 = vsyncpa [#allocation4], 1 }

</bundles_post_ra>
